<compile_context>
chip_gen: v6e
topology: v6e:2x2x1
jax: 0.10.0
libtpu: 0.0.40
codegen_flags: <defaults>
</compile_context>

<pallas_src>
import jax
import jax.numpy as jnp
from jax.experimental import pallas as pl
from jax.experimental.pallas import tpu as pltpu


def _ddpm_forward_kernel(scale_ref, x_ref, eta_ref, out_ref):
    """One grid step handles a (TM, TK) slab.

    scale_ref      : VMEM f32[TM, 2]  col 0 = sqrt(a_bar), col 1 = sqrt(1-a_bar)
    x_ref, eta_ref : VMEM [TM, TK]    flattened samples (input dtype)
    out_ref        : VMEM [TM, TK]
    """
    s = scale_ref[...]                     # (TM, 2) f32
    sab = s[:, 0:1]                        # (TM, 1) broadcast over lanes
    s1m = s[:, 1:2]
    # f32 scales promote the (possibly bf16) data per-vreg; store casts back.
    out_ref[...] = (sab * x_ref[...] + s1m * eta_ref[...]).astype(out_ref.dtype)


def _choose_tiles(n, k, itemsize):
    """Pick (tm, tk): ~2 MiB blocks, dtype-aligned rows, >=2 grid steps when free."""
    sub = {4: 8, 2: 16, 1: 32}.get(int(itemsize), 8)   # sublane packing of data dtype
    target_bytes = 2 * 1024 * 1024                      # near the HBM-roofline knee
    target_elems = target_bytes // itemsize

    # K tile: full row if small, otherwise a multiple of 128 near target/`sub` rows.
    if k <= 128 or k * itemsize <= 1024 * 1024:
        tk = k
    else:
        tk = min(k, max(128, (target_elems // sub) // 128 * 128))

    # Row tile: as many rows as fit the target, rounded to the sublane packing.
    tm = min(n, max(sub, (target_elems // max(tk, 1)) // sub * sub))

    # Ensure at least two grid steps (megacore on v7x + DMA overlap) when possible.
    if pl.cdiv(n, tm) * pl.cdiv(k, tk) < 2:
        if tk == k and k >= 256:
            tk = -(-(k // 2) // 128) * 128              # ~K/2, rounded up to 128
        elif tm == n and n >= 2 * sub:
            tm = max(sub, ((n // 2) // sub) * sub)
    return tm, tk


def ddpm_forward(x0, t, eta, *, n_steps=200, min_beta=1e-4, max_beta=0.02):
    """JAX/Pallas equivalent of DDPMModel.forward (NCHW inputs)."""
    n, c, h, w = x0.shape
    k = c * h * w
    dtype = x0.dtype
    itemsize = jnp.dtype(dtype).itemsize

    # Noise schedule (plain JAX glue; negligible cost).
    betas = jnp.linspace(min_beta, max_beta, n_steps, dtype=jnp.float32)
    alpha_bars = jnp.cumprod(1.0 - betas)
    a_bar = alpha_bars[t].astype(jnp.float32)                       # (n,)
    scales = jnp.stack([jnp.sqrt(a_bar), jnp.sqrt(1.0 - a_bar)], axis=1)  # (n, 2) f32

    # Lane-dense 2-D slab: one row per sample, K = C*H*W lanes.
    x_flat = x0.reshape(n, k)
    e_flat = eta.reshape(n, k)

    tm, tk = _choose_tiles(n, k, itemsize)
    grid = (pl.cdiv(n, tm), pl.cdiv(k, tk))        # ragged last blocks are masked

    data_spec = pl.BlockSpec((tm, tk), lambda i, j: (i, j))
    scale_spec = pl.BlockSpec((tm, 2), lambda i, j: (i, 0))

    cost = pl.CostEstimate(
        flops=3 * n * k,                            # 2 mul + 1 add per element
        transcendentals=0,
        bytes_accessed=3 * n * k * itemsize + n * 2 * 4,
    )

    noisy_flat = pl.pallas_call(
        _ddpm_forward_kernel,
        out_shape=jax.ShapeDtypeStruct((n, k), dtype),
        grid=grid,
        in_specs=[scale_spec, data_spec, data_spec],
        out_specs=data_spec,
        compiler_params=pltpu.CompilerParams(
            dimension_semantics=("parallel", "parallel"),
            vmem_limit_bytes=32 << 20,              # safe on v5e/v6e/v7x
        ),
        cost_estimate=cost,
    )(scales, x_flat, e_flat)

    return noisy_flat.reshape(n, c, h, w)


if __name__ == "__main__":
    key = jax.random.PRNGKey(0)
    k_x, k_eta, k_t = jax.random.split(key, 3)

    N, C, H, W = 2, 4, 16, 16
    n_steps = 200

    x0 = jax.random.normal(k_x, (N, C, H, W), dtype=jnp.float32)
    eta = jax.random.normal(k_eta, (N, C, H, W), dtype=jnp.float32)
    t = jax.random.randint(k_t, (N,), 0, n_steps, dtype=jnp.int32)

    noisy = jax.block_until_ready(ddpm_forward(x0, t, eta, n_steps=n_steps))

    # Pure-JAX reference for correctness.
    betas = jnp.linspace(1e-4, 0.02, n_steps, dtype=jnp.float32)
    alpha_bars = jnp.cumprod(1.0 - betas)
    a_bar = alpha_bars[t]
    ref = (jnp.sqrt(a_bar).reshape(N, 1, 1, 1) * x0
           + jnp.sqrt(1.0 - a_bar).reshape(N, 1, 1, 1) * eta)

    assert noisy.shape == (N, C, H, W)
    assert noisy.dtype == x0.dtype
    assert jnp.allclose(noisy, ref, atol=1e-5, rtol=1e-5)
    print("KERNEL_OK")

    # TODO(synk): DDPMModel.backward delegates to an arbitrary external
    # `network` module; no network architecture is defined in the spec, so it
    # is not implemented here.
</pallas_src>

<mosaic_0001>
module attributes {stable_mosaic.version = 11 : i64} {
  func.func @_ddpm_forward_kernel(%arg0: i32, %arg1: i32, %arg2: memref<2x2xf32, #tpu.memory_space<vmem>>, %arg3: memref<2x512xf32, #tpu.memory_space<vmem>>, %arg4: memref<2x512xf32, #tpu.memory_space<vmem>>, %arg5: memref<2x512xf32, #tpu.memory_space<vmem>>) attributes {dimension_semantics = [#tpu.dimension_semantics<parallel>, #tpu.dimension_semantics<parallel>], iteration_bounds = array<i64: 1, 2>, scalar_prefetch = 0 : i64, scratch_operands = 0 : i64, tpu.core_type = #tpu.core_type<tc>, window_params = [{transform_indices = @transform_0, window_bounds = array<i64: 2, 2>}, {transform_indices = @transform_1, window_bounds = array<i64: 2, 512>}, {transform_indices = @transform_2, window_bounds = array<i64: 2, 512>}, {transform_indices = @transform_3, window_bounds = array<i64: 2, 512>}]} {
    %c0 = arith.constant 0 : index
    %c0_0 = arith.constant 0 : index
    %0 = vector.load %arg2[%c0, %c0_0] : memref<2x2xf32, #tpu.memory_space<vmem>>, vector<2x2xf32>
    %1 = vector.extract_strided_slice %0 {offsets = [0, 0], sizes = [2, 1], strides = [1, 1]} : vector<2x2xf32> to vector<2x1xf32>
    %2 = vector.extract_strided_slice %0 {offsets = [0, 1], sizes = [2, 1], strides = [1, 1]} : vector<2x2xf32> to vector<2x1xf32>
    %c0_1 = arith.constant 0 : index
    %c0_2 = arith.constant 0 : index
    %3 = vector.load %arg3[%c0_1, %c0_2] : memref<2x512xf32, #tpu.memory_space<vmem>>, vector<2x512xf32>
    %4 = vector.broadcast %1 : vector<2x1xf32> to vector<2x512xf32>
    %5 = arith.mulf %4, %3 : vector<2x512xf32>
    %c0_3 = arith.constant 0 : index
    %c0_4 = arith.constant 0 : index
    %6 = vector.load %arg4[%c0_3, %c0_4] : memref<2x512xf32, #tpu.memory_space<vmem>>, vector<2x512xf32>
    %7 = vector.broadcast %2 : vector<2x1xf32> to vector<2x512xf32>
    %8 = arith.mulf %7, %6 : vector<2x512xf32>
    %9 = arith.addf %5, %8 : vector<2x512xf32>
    %c0_5 = arith.constant 0 : index
    %c0_6 = arith.constant 0 : index
    %10 = vector.load %arg5[%c0_5, %c0_6] : memref<2x512xf32, #tpu.memory_space<vmem>>, vector<2x512xf32>
    tpu.vector_store %arg5[%c0_5, %c0_6], %9 {strides = array<i32>} : memref<2x512xf32, #tpu.memory_space<vmem>>, vector<2x512xf32>,
    return
  }
  func.func @transform_0(%arg0: i32, %arg1: i32) -> (i32, i32) {
    %c0_i32 = arith.constant 0 : i32
    %c0_i32_0 = arith.constant 0 : i32
    return %arg0, %c0_i32 : i32, i32
  }
  func.func @transform_1(%arg0: i32, %arg1: i32) -> (i32, i32) {
    %c0_i32 = arith.constant 0 : i32
    return %arg0, %arg1 : i32, i32
  }
  func.func @transform_2(%arg0: i32, %arg1: i32) -> (i32, i32) {
    %c0_i32 = arith.constant 0 : i32
    return %arg0, %arg1 : i32, i32
  }
  func.func @transform_3(%arg0: i32, %arg1: i32) -> (i32, i32) {
    %c0_i32 = arith.constant 0 : i32
    return %arg0, %arg1 : i32, i32
  }
}

</mosaic_0001>

<bundles_post_ra>
// kernel: tpu_custom_call.1
= control target key start
LH: loop header
LB: loop body
LE: loop exit
PB: predicated region body
PF: predicated region fallthrough
CT: control target
= control target key end

     0   :  { %8 = vsyncpa [#allocation3], 0  ;;  %s985_s0 = inlined_call_operand.hbm [shape: f32[2,2], index: 0, kind: input, shape index: {}]   ;;  %s986_s1 = inlined_call_operand.hbm [shape: f32[2,1024], index: 1, kind: input, shape index: {}]   ;;  %s987_s2 = inlined_call_operand.hbm [shape: f32[2,1024], index: 2, kind: input, shape index: {}]   ;;  %s988_s3 = inlined_call_operand.hbm [shape: f32[2,1024], index: 3, kind: output, shape index: {}]  }
   0x1   :  { %9 = vsyncpa [#allocation6], 0 }
   0x2   :  { %11 = vsyncpa [#allocation6 + $0x1], 0 }
   0x3   :  { %12 = vsyncpa [#allocation4], 0 }
   0x4   :  { %14 = vsyncpa [#allocation4 + $0x1], 0  ;;  %s800_s12 = smov 0   ;;  %s802_s13 = smov 0  }
   0x5   :  { %s804_s14 = smov 0   ;;  %s806_s15 = smov 0  }
   0x6   :  { %s808_s16 = smov 0   ;;  %s810_s17 = smov 0  }
   0x7 LB: > { %s29_s18 = sadd.s32 1, %s767_s16  ;;  %s67_s19 = sadd.s32 1, %s759_s14  ;;  %s771_s17 = sphi %s810_s17, %s20_s17   ;;  %s767_s16 = sphi %s808_s16, %s1009_s16   ;;  %s763_s15 = sphi %s806_s15, %s1008_s15   ;;  %s759_s14 = sphi %s804_s14, %s1007_s14   ;;  %s755_s13 = sphi %s802_s13, %s1006_s13   ;;  %s751_s12 = sphi %s800_s12, %s1005_s12  }
   0x8   : > { %p30_p0 = scmp.ge.s32.totalorder %s29_s18, 2  ;;  %p74_p1 = scmp.ne.s32.totalorder %s759_s14, %s755_s13 }
   0x9   : > { %p75_p2 = scmp.eq.s32.totalorder %s771_s17, 0  ;;  %p546_p5 = scmp.lt.s32.totalorder %s771_s17, 2 }
   0xa   : > { %s1011_s18 = smov (%p30_p0, %s29_s18), 0  ;;  %s173_s21 = sand.u32 1, %s771_s17  }
   0xb   : > { %p76_p4 = por %p75_p2, %p74_p1  ;;  %s63_s20 = ssub.s32 %s767_s16, %s1011_s18 }
   0xc   : > { %p65_p6 = scmp.eq.s32.totalorder %s63_s20, 0  ;;  %s175_s22 = sand.u32 1, %s759_s14  }
   0xd   : > { %s517_s23 = sshll.u32 %s767_s16, 7  ;;  %s850_s25 = sshll.u32 %s175_s22, 3 }
   0xe   : > { %s848_s24 = scalar_select %p65_p6, %s759_s14, %s67_s19  }
   0xf   : > { %s185_s28 = scalar_lea.hbm %s986_s1, %s517_s23  ;;  %p857_p7 = pnand %p546_p5, %p76_p4 }
  0x10   : > { %s177_s30 = scalar_lea.vmem [#allocation5], %s850_s25  ;;  %s862_s5 = scalar_lea.sflag [#allocation6], %s173_s21 }
  0x11   : > { %s187_s4 = sshll.u32 %s177_s30, 4  ;;  %p607_p8 = pneg %p857_p7  ;;  %s188_s4 = int_to_ptr.vmem [resolvable:$true] %s187_s4 }
  0x12   : > { %s618_s6 = scalar_lea.vmem %s188_s4, 128  ;;  %s773_s7 = smov [#allocation5]  }
  0x13   : > { %p619_p9 = scmp.ne.s32.totalorder %s188_s4, %s618_s6  ;;  %s623_s8 = sshll.u32 %s773_s7, 4  ;;  %s624_s8 = int_to_ptr.vmem [resolvable:$false] %s623_s8 }
  0x14   : > { %s625_s9 = scalar_lea.vmem %s624_s8, 256  ;;  %p626_p12 = scmp.lt.s32.totalorder %s188_s4, %s624_s8 }
  0x15   : > { %p621_p10 = pnand %p619_p9, %p607_p8  ;;  %p627_p13 = scmp.lt.s32.totalorder %s625_s9, %s618_s6 }
  0x17   : > { %p622_p11 = pneg %p621_p10  ;;  %p628_p0 = por %p627_p13, %p626_p12 }
  0x19   : > { %p629_p2 = pnand %p628_p0, %p622_p11 }
  0x1b   : > { %632 = shalt.err (!%p629_p2)
}
  0x1c   : > { %537 = dma.hbm_to_vmem [thread:$0]  (!%p857_p7), %s185_s28, 128, %s188_s4, %s862_s5  }
  0x1d   : > { %s873_s10 = sadd.s32 4294967295, %s771_s17   ;;  %s497_s11 = sadd.s32 4294967294, %s771_s17  }
  0x1e   : > { %p80_p4 = scmp.ne.s32.totalorder %s755_s13, %s751_s12  ;;  %p989_p5 = scmp.eq.s32.totalorder %s873_s10, 0 }
  0x1f   : > { %p134_p6 = scmp.eq.s32.totalorder %s873_s10, 1  ;;  %p140_p9 = scmp.eq.s32.totalorder %s497_s11, 1 }
  0x20   : > { %p498_p10 = scmp.ge.s32.totalorder %s771_s17, 1  ;;  %p883_p11 = por %p989_p5, %p80_p4 }
  0x21   : > { %p890_p12 = por %p134_p6, %p74_p1  ;;  %p894_p13 = por %p140_p9, %p80_p4 }
  0x22   : > { %s993_s19 = scalar_select %p883_p11, 1, 0 }
  0x23   : > { %s994_s20 = scalar_select %p890_p12, 1, 0 }
  0x24   : > { %s995_s21 = scalar_select %p894_p13, 1, 0 }
  0x25   : > { %p147_p0 = scmp.lt.s32.totalorder %s771_s17, 3  ;;  %s206_s27 = scalar_lea.hbm %s987_s2, %s517_s23 }
  0x26   : > { %s774_s30 = smov [#allocation2]   ;;  %s198_s6 = scalar_lea.vmem [#allocation7], %s850_s25 }
  0x27   : > { %p904_p2 = pnand %p498_p10, %p147_p0  ;;  %s162_s4 = sshll.u32 %s774_s30, 4  ;;  %s163_s4 = int_to_ptr.vmem [resolvable:$true] %s162_s4 }
  0x28   : > { %s208_s7 = sshll.u32 %s198_s6, 4  ;;  %s775_s9 = smov [#allocation7]   ;;  %s209_s7 = int_to_ptr.vmem [resolvable:$true] %s208_s7 }
  0x29   : > { %s646_s8 = scalar_lea.vmem %s209_s7, 128  ;;  %s651_s23 = sshll.u32 %s775_s9, 4  ;;  %s652_s23 = int_to_ptr.vmem [resolvable:$false] %s651_s23 }
  0x2a   : > { %p647_p4 = scmp.ne.s32.totalorder %s209_s7, %s646_s8  ;;  %s653_s11 = scalar_lea.vmem %s652_s23, 256 }
  0x2b   : > { %p654_p10 = scmp.lt.s32.totalorder %s209_s7, %s652_s23  ;;  %p655_p0 = scmp.lt.s32.totalorder %s653_s11, %s646_s8 }
  0x2c   : > { %p649_p6 = pnand %p647_p4, %p607_p8 }
  0x2d   : > { %p656_p3 = por %p655_p0, %p654_p10 }
  0x2e   : > { %p650_p9 = pneg %p649_p6 }
  0x30   : > { %p657_p5 = pnand %p656_p3, %p650_p9 }
  0x32   : > { %660 = shalt.err (!%p657_p5)
}
  0x33   : > { %540 = dma.hbm_to_vmem [thread:$0]  (!%p857_p7), %s206_s27, 128, %s209_s7, %s862_s5  }
  0x34   : > { %p997_p1 = scmp.eq.s32.totalorder %s873_s10, 0  ;;  %p998_p8 = pneg %p904_p2 }
  0x35   : > { %s672_s25 = scalar_lea.vmem %s163_s4, 32  ;;  %p680_p0 = scmp.lt.s32.totalorder %s163_s4, %s163_s4 }
  0x36   : > { %p531_p4 = pnand %p998_p8, %p997_p1  ;;  %p673_p13 = scmp.ne.s32.totalorder %s163_s4, %s672_s25 }
  0x37   : > { %p681_p10 = scmp.lt.s32.totalorder %s672_s25, %s672_s25 }
  0x38   : > { %p663_p6 = pneg %p531_p4 }
  0x39   : > { %p682_p3 = por %p681_p10, %p680_p0 }
  0x3a   : > { %p675_p12 = pnand %p673_p13, %p663_p6 }
  0x3c   : > { %p676_p11 = pneg %p675_p12 }
  0x3e   : > { %p683_p5 = pnand %p682_p3, %p676_p11 }
  0x40   : > { %686 = shalt.err (!%p683_p5)
}
  0x41   : > { %533 = dma.hbm_to_vmem [thread:$0]  (!%p531_p4), %s985_s0, 32, %s163_s4, [#allocation3]  }
  0x42   : > { %217 = sbr.rel (%p904_p2) target bundleno = 231 (0xe7), region = 32  ;;  %p999_p7 = scmp.eq.s32.totalorder (!%p904_p2), %s873_s10, 0 }
  0x47   : > { %738 = dma.done.wait (%p999_p7), [#allocation3], 32   ;;  %p1000_p1 = pmov %p999_p7 }
  0x48   : > { %s223_s5 = sand.u32 1, %s873_s10   ;;  %s225_s26 = sand.u32 1, %s755_s13  }
  0x49   : > { %740 = vsyncadd (%p1000_p1), [#allocation3], 4294967264  ;;  %s935_s27 = sshll.u32 %s225_s26, 3  ;;  %s224_s30 = scalar_lea.sflag [#allocation6], %s223_s5 }
  0x4a   : > { %s227_s4 = scalar_lea.vmem [#allocation5], %s935_s27  ;;  %p1001_p11 = scmp.ne.s32.totalorder %s993_s19, 0 }
  0x4c   : > { %742 = dma.done.wait (%p1001_p11), %s224_s30, 256  }
  0x4d   : > { %744 = vsyncadd (%p1001_p11), %s224_s30, 4294967040  ;;  %v776_v0 = vmov 0   ;;  %v267_v1 = vld [vmem:[#allocation2] sm:$0x3]  ;;  %v777_v2 = vmov 1   ;;  %v279_v5 = vlaneseq  ;;  %v268_v8 = vld [vmem:[%s227_s4] sm:$0xff] }
  0x4e   : > { %601 = vset.pattern.permute.xlu0 %v776_v0  ;;  %v778_v3 = vmov 1983009808   ;;  %s236_s10 = scalar_lea.vmem [#allocation7], %s935_s27  ;;  %v275_v10 = vcombine.high %v268_v8, %v268_v8  ;;  %s519_s19 = sshll.u32 %s763_s15, 7 }
  0x4f   : > { %271 = vperm.xlu0 %601, %v267_v1   ;;  %v277_v4 = vunpack.c.l.s4 %v778_v3  ;;  %v280_v7 = vshrl.u32 %v279_v5, 7  ;;  %v300_v9 = vld [vmem:[%s236_s10] sm:$0xff]  ;;  %s263_s28 = scalar_lea.vmem [#allocation8], %s935_s27  ;;  %s373_s9 = scalar_lea.hbm %s988_s3, %s519_s19 }
  0x50   : > { %v306_v12 = vcombine.high %v300_v9, %v300_v9  ;;  %s375_s6 = sshll.u32 %s263_s28, 4  ;;  %s359_s23 = scalar_lea.sflag [#allocation4], %s225_s26  ;;  %s376_s6 = int_to_ptr.vmem [resolvable:$true] %s375_s6 }
  0x51   : > { %v278_v6 = vunpack.c.0.s8 %v277_v4  ;;  %s687_s11 = scalar_lea.vmem %s376_s6, 128  ;;  %p1002_p13 = scmp.ne.s32.totalorder %s994_s20, 0 }
  0x52   : > { %p688_p12 = scmp.ne.s32.totalorder %s376_s6, %s687_s11  ;;  %s779_s25 = smov [#allocation8]  }
  0x53   : > { %602 = vset.pattern.permute.xlu0 %v777_v2  ;;  %v281_v11 = vsub.s32 %v278_v6, %v280_v7  ;;  %s691_s15 = sshll.u32 %s779_s25, 4  ;;  %s692_s15 = int_to_ptr.vmem [resolvable:$false] %s691_s15 }
  0x54   : > { %302 = vperm.xlu0 %602, %v267_v1   ;;  %p689_p2 = pnand %p688_p12, %p1002_p13  ;;  %s693_s29 = scalar_lea.vmem %s692_s15, 256 }
  0x55   : > { %v282_v13 = vrot.slane %v268_v8, %v281_v11  ;;  %v289_v14 = vrot.slane %v275_v10, %v281_v11  ;;  %v313_v15 = vrot.slane %v300_v9, %v281_v11  ;;  %v320_v16 = vrot.slane %v306_v12, %v281_v11  ;;  %p694_p8 = scmp.lt.s32.totalorder %s376_s6, %s692_s15  ;;  %p695_p4 = scmp.lt.s32.totalorder %s693_s29, %s687_s11 }
  0x56   : > { %p690_p9 = pneg %p689_p2 }
  0x57   : > { %v290_v18 = vcombine.high %v282_v13, %v282_v13  ;;  %v291_v19 = vcombine.high %v289_v14, %v289_v14  ;;  %v321_v20 = vcombine.high %v313_v15, %v313_v15  ;;  %v322_v21 = vcombine.high %v320_v16, %v320_v16  ;;  %p696_p6 = por %p695_p4, %p694_p8 }
  0x59   : > { %p697_p0 = pnand %p696_p6, %p690_p9 }
  0xca   : > { %v272_v17 = vpop.permute.xlu0 %271 }
  0xcb   : > { %v296_v22 = vmul.f32 %v282_v13, %v272_v17  ;;  %v297_v23 = vmul.f32 %v290_v18, %v272_v17  ;;  %v298_v24 = vmul.f32 %v289_v14, %v272_v17  ;;  %v299_v25 = vmul.f32 %v291_v19, %v272_v17 }
  0xcf   : > { %v303_v26 = vpop.permute.xlu0 %302 }
  0xd0   : > { %v327_v27 = vmul.f32 %v313_v15, %v303_v26  ;;  %v328_v28 = vmul.f32 %v321_v20, %v303_v26  ;;  %v329_v29 = vmul.f32 %v320_v16, %v303_v26  ;;  %v330_v30 = vmul.f32 %v322_v21, %v303_v26 }
  0xd2   : > { %v331_v31 = vadd.f32 %v327_v27, %v296_v22  ;;  %v332_v32 = vadd.f32 %v328_v28, %v297_v23  ;;  %v333_v33 = vadd.f32 %v329_v29, %v298_v24  ;;  %v334_v34 = vadd.f32 %v330_v30, %v299_v25 }
  0xd4   : > { %v339_v35 = vcombine.low %v331_v31, %v332_v32  ;;  %v340_v36 = vcombine.low %v333_v33, %v334_v34 }
  0xd6   : > { %v347_v37 = vrot.slane %v339_v35, %v281_v11  ;;  %v354_v38 = vrot.slane %v340_v36, %v281_v11 }
  0xd8   : > { %v355_v39 = vcombine.low %v347_v37, %v354_v38 }
  0xda   : > { %357 = vst [vmem:[%s263_s28] sm:$0xff] %v355_v39 }
  0xdb   : > { %700 = shalt.err (!%p697_p0)
}
  0xdc   : > { %s701_s22 = scalar_lea.hbm %s373_s9, 128  ;;  %s705_s27 = scalar_lea.hbm %s988_s3, 256 }
  0xdd   : > { %p702_p10 = scmp.ne.s32.totalorder %s373_s9, %s701_s22  ;;  %p706_p7 = scmp.lt.s32.totalorder %s373_s9, %s988_s3 }
  0xde   : > { %p707_p1 = scmp.lt.s32.totalorder %s705_s27, %s701_s22 }
  0xdf   : > { %p703_p3 = pnand %p702_p10, %p1002_p13 }
  0xe0   : > { %p708_p11 = por %p707_p1, %p706_p7 }
  0xe1   : > { %p704_p5 = pneg %p703_p3 }
  0xe3   : > { %p709_p12 = pnand %p708_p11, %p704_p5 }
  0xe5   : > { %712 = shalt.err (!%p709_p12)
}
  0xe6   : > { %528 = dma.vmem_to_hbm [thread:$0]  (%p1002_p13), %s376_s6, 128, %s373_s9, %s359_s23  }
  0xe7 PF: > { %s387_s10 = sand.u32 1, %s751_s12   ;;  %p1003_p2 = scmp.ne.s32.totalorder %s995_s21, 0 }
  0xe8   : > { %p1004_p9 = scmp.ge.s32.totalorder %s771_s17, 2  ;;  %s388_s19 = scalar_lea.sflag [#allocation4], %s387_s10 }
  0xea   : > { %p542_p8 = pnand %p1004_p9, %p1003_p2 }
  0xec   : > { %p543_p4 = pneg %p542_p8 }
  0xee   : > { %746 = dma.done.wait (%p543_p4), %s388_s19, 128  }
  0xef   : > { %748 = vsyncadd (%p543_p4), %s388_s19, 4294967168  ;;  %s20_s17 = sadd.s32 1, %s771_s17   ;;  %s1005_s12 = smov %s755_s13 }
  0xf0   : > { %p17_p6 = scmp.ge.s32.totalorder %s20_s17, 4   ;;  %s1006_s13 = smov %s759_s14 }
  0xf1   : > { %s1007_s14 = smov %s848_s24  ;;  %s1008_s15 = smov %s767_s16 }
  0xf2   : > { %s1009_s16 = smov %s1011_s18  ;;  %19 = sbr.rel (!%p17_p6) target bundleno = 7 (0x7), region = 94 }
  0xf7   :  { %393 = vsyncpa [#allocation3], 1 }
  0xf8   :  { %395 = vsyncpa [#allocation3 + $0x1], 1 }
  0xf9   :  { %396 = vsyncpa [#allocation6], 1 }
  0xfa   :  { %398 = vsyncpa [#allocation6 + $0x1], 1 }
  0xfb   :  { %399 = vsyncpa [#allocation4], 1 }
  0xfc   :  { %401 = vsyncpa [#allocation4 + $0x1], 1 }

</bundles_post_ra>
